<compile_context>
chip_gen: v5e
topology: v5e:2x2
jax: 0.10.0
libtpu: 0.0.40
codegen_flags: <defaults>
</compile_context>

<pallas_src>
import jax
import jax.numpy as jnp
from jax.experimental import pallas as pl
from jax.experimental.pallas import tpu as pltpu


def pa_kernel(x_ref, w_ref, b_ref, o_ref):
    x = x_ref[0]                                                     # (C, T), spatial-minor
    z = jnp.dot(w_ref[...], x, preferred_element_type=jnp.float32)   # 1x1 conv = channel matmul
    z = z + b_ref[...]                                               # (C, 1) bias, lane broadcast
    y = 1.0 / (1.0 + jnp.exp(-z))                                    # sigmoid (exp on EUP slot)
    o_ref[0] = (x * y).astype(o_ref.dtype)


def _choose_spatial_tile(hw_p, C, n_batch, itemsize):
    """Largest 128-multiple divisor of hw_p that fits a ~16 MiB VMEM working set."""
    budget = 16 * 1024 * 1024
    per_col = 4 * C * max(itemsize, 4)        # 2 dbl-buffered in + 2 out blocks, per lane column
    max_t = max(128, budget // per_col)
    n128 = hw_p // 128
    t = 128
    for k in range(1, n128 + 1):
        cand = 128 * k
        if n128 % k == 0 and cand <= max_t:
            t = cand
    # Guarantee >= 2 grid units so megacore / dual-TC always has something to shard.
    while n_batch * (hw_p // t) < 2 and t % 256 == 0:
        t //= 2
    return t


def pa_forward(x_nchw, w, b):
    """x_nchw: (N, C, H, W); w: Conv2d(nf, nf, 1) weight (C,C) or (C,C,1,1); b: (C,)."""
    N, C, H, W = x_nchw.shape
    hw = H * W
    hw_p = ((hw + 127) // 128) * 128                   # pad spatial to lane multiple

    x = x_nchw.reshape(N, C, hw)                       # free reshape, stays NC(HW)
    if hw_p != hw:
        x = jnp.pad(x, ((0, 0), (0, 0), (0, hw_p - hw)))

    t = _choose_spatial_tile(hw_p, C, N, x.dtype.itemsize)

    w2 = jnp.asarray(w).reshape(C, C).astype(x.dtype)  # (C_out, C_in)
    b2 = jnp.asarray(b).reshape(C, 1).astype(jnp.float32)

    out = pl.pallas_call(
        pa_kernel,
        out_shape=jax.ShapeDtypeStruct((N, C, hw_p), x_nchw.dtype),
        grid=(N, hw_p // t),
        in_specs=[
            pl.BlockSpec((1, C, t), lambda n, s: (n, 0, s)),
            pl.BlockSpec((C, C), lambda n, s: (0, 0)),
            pl.BlockSpec((C, 1), lambda n, s: (0, 0)),
        ],
        out_specs=pl.BlockSpec((1, C, t), lambda n, s: (n, 0, s)),
        compiler_params=pltpu.CompilerParams(
            dimension_semantics=("parallel", "parallel")),
    )(x, w2, b2)

    if hw_p != hw:
        out = out[:, :, :hw]
    return out.reshape(N, C, H, W)


def pa_reference(x_nchw, w, b):
    """Pure-JAX reference matching the PyTorch PA.forward."""
    C = x_nchw.shape[1]
    x = x_nchw.astype(jnp.float32)
    w2 = jnp.asarray(w).reshape(C, C).astype(jnp.float32)
    z = jnp.einsum("oc,nchw->nohw", w2, x) + jnp.asarray(b).reshape(1, C, 1, 1)
    y = 1.0 / (1.0 + jnp.exp(-z))
    return (x * y).astype(x_nchw.dtype)


if __name__ == "__main__":
    key = jax.random.PRNGKey(0)
    kx, kw, kb = jax.random.split(key, 3)

    N, nf, H, W = 2, 4, 16, 16                               # NCHW, matching PA(nf=4)
    x = jax.random.normal(kx, (N, nf, H, W), jnp.float32)
    w = 0.1 * jax.random.normal(kw, (nf, nf), jnp.float32)   # Conv2d(nf, nf, 1) weight
    b = 0.1 * jax.random.normal(kb, (nf,), jnp.float32)      # Conv2d bias

    out = jax.block_until_ready(pa_forward(x, w, b))
    ref = jax.block_until_ready(pa_reference(x, w, b))

    assert out.shape == (N, nf, H, W)
    assert out.dtype == x.dtype
    assert jnp.allclose(out, ref, rtol=1e-3, atol=1e-3), "mismatch vs reference"
    print("KERNEL_OK")
</pallas_src>

<mosaic_0001>
module attributes {stable_mosaic.version = 11 : i64} {
  func.func @pa_kernel(%arg0: i32, %arg1: i32, %arg2: memref<1x4x256xf32, #tpu.memory_space<vmem>>, %arg3: memref<4x4xf32, #tpu.memory_space<vmem>>, %arg4: memref<4x1xf32, #tpu.memory_space<vmem>>, %arg5: memref<1x4x256xf32, #tpu.memory_space<vmem>>) attributes {dimension_semantics = [#tpu.dimension_semantics<parallel>, #tpu.dimension_semantics<parallel>], iteration_bounds = array<i64: 2, 1>, scalar_prefetch = 0 : i64, scratch_operands = 0 : i64, tpu.core_type = #tpu.core_type<tc>, window_params = [{transform_indices = @transform_0, window_bounds = array<i64: 1, 4, 256>}, {pipeline_mode = #tpu.pipeline_mode<synchronous>, transform_indices = @transform_1, window_bounds = array<i64: 4, 4>}, {pipeline_mode = #tpu.pipeline_mode<synchronous>, transform_indices = @transform_2, window_bounds = array<i64: 4, 1>}, {transform_indices = @transform_3, window_bounds = array<i64: 1, 4, 256>}]} {
    %c0 = arith.constant 0 : index
    %c0_0 = arith.constant 0 : index
    %c0_1 = arith.constant 0 : index
    %0 = vector.load %arg2[%c0, %c0_0, %c0_1] : memref<1x4x256xf32, #tpu.memory_space<vmem>>, vector<1x4x256xf32>
    %1 = vector.shape_cast %0 : vector<1x4x256xf32> to vector<4x256xf32>
    %c0_2 = arith.constant 0 : index
    %c0_3 = arith.constant 0 : index
    %2 = vector.load %arg3[%c0_2, %c0_3] : memref<4x4xf32, #tpu.memory_space<vmem>>, vector<4x4xf32>
    %cst = arith.constant dense<0.000000e+00> : vector<4x256xf32>
    %3 = tpu.matmul %2, %1, %cst {dimension_numbers = #tpu.dot_dimension_numbers<[1], [0], [0], [1], [0, 0, 1, 1], [], []>} : vector<4x4xf32>, vector<4x256xf32>, vector<4x256xf32> -> vector<4x256xf32>
    %c0_4 = arith.constant 0 : index
    %c0_5 = arith.constant 0 : index
    %4 = vector.load %arg4[%c0_4, %c0_5] : memref<4x1xf32, #tpu.memory_space<vmem>>, vector<4x1xf32>
    %5 = vector.broadcast %4 : vector<4x1xf32> to vector<4x256xf32>
    %6 = arith.addf %3, %5 : vector<4x256xf32>
    %cst_6 = arith.constant 0.000000e+00 : f32
    %7 = vector.broadcast %cst_6 : f32 to vector<4x256xf32>
    %8 = arith.subf %7, %6 : vector<4x256xf32>
    %9 = math.exp %8 : vector<4x256xf32>
    %cst_7 = arith.constant 1.000000e+00 : f32
    %10 = vector.broadcast %cst_7 : f32 to vector<4x256xf32>
    %11 = arith.addf %10, %9 : vector<4x256xf32>
    %cst_8 = arith.constant 1.000000e+00 : f32
    %12 = vector.broadcast %cst_8 : f32 to vector<4x256xf32>
    %13 = arith.divf %12, %11 : vector<4x256xf32>
    %14 = arith.mulf %1, %13 : vector<4x256xf32>
    %c0_9 = arith.constant 0 : index
    %c0_10 = arith.constant 0 : index
    %c0_11 = arith.constant 0 : index
    %15 = vector.load %arg5[%c0_9, %c0_10, %c0_11] : memref<1x4x256xf32, #tpu.memory_space<vmem>>, vector<1x4x256xf32>
    %16 = vector.shape_cast %15 : vector<1x4x256xf32> to vector<4x256xf32>
    %17 = vector.shape_cast %14 : vector<4x256xf32> to vector<1x4x256xf32>
    tpu.vector_store %arg5[%c0_9, %c0_10, %c0_11], %17 {strides = array<i32>} : memref<1x4x256xf32, #tpu.memory_space<vmem>>, vector<1x4x256xf32>,
    return
  }
  func.func @transform_0(%arg0: i32, %arg1: i32) -> (i32, i32, i32) {
    %c0_i32 = arith.constant 0 : i32
    %c0_i32_0 = arith.constant 0 : i32
    return %arg0, %c0_i32, %arg1 : i32, i32, i32
  }
  func.func @transform_1(%arg0: i32, %arg1: i32) -> (i32, i32) {
    %c0_i32 = arith.constant 0 : i32
    %c0_i32_0 = arith.constant 0 : i32
    %c0_i32_1 = arith.constant 0 : i32
    return %c0_i32, %c0_i32_0 : i32, i32
  }
  func.func @transform_2(%arg0: i32, %arg1: i32) -> (i32, i32) {
    %c0_i32 = arith.constant 0 : i32
    %c0_i32_0 = arith.constant 0 : i32
    %c0_i32_1 = arith.constant 0 : i32
    return %c0_i32, %c0_i32_0 : i32, i32
  }
  func.func @transform_3(%arg0: i32, %arg1: i32) -> (i32, i32, i32) {
    %c0_i32 = arith.constant 0 : i32
    %c0_i32_0 = arith.constant 0 : i32
    return %arg0, %c0_i32, %arg1 : i32, i32, i32
  }
}

</mosaic_0001>

<bundles_post_ra>
// kernel: tpu_custom_call.1
= control target key start
LH: loop header
LB: loop body
LE: loop exit
PB: predicated region body
PF: predicated region fallthrough
CT: control target
= control target key end

     0   :  { %8 = vsyncpa [#allocation3], 0  ;;  %s789_s0 = inlined_call_operand.hbm [shape: f32[2,4,256], index: 0, kind: input, shape index: {}]   ;;  %s790_s1 = inlined_call_operand.vmem [shape: f32[4,4], index: 1, kind: input, shape index: {}]   ;;  %s791_s2 = inlined_call_operand.vmem [shape: f32[4,1], index: 2, kind: input, shape index: {}]   ;;  %s792_s3 = inlined_call_operand.hbm [shape: f32[2,4,256], index: 3, kind: output, shape index: {}]  }
   0x1   :  { %10 = vsyncpa [#allocation3 + $0x1], 0 }
   0x2   :  { %11 = vsyncpa [#allocation4], 0 }
   0x3   :  { %13 = vsyncpa [#allocation4 + $0x1], 0  ;;  %s646_s12 = smov 0   ;;  %s648_s13 = smov 0  }
   0x4   :  { %s650_s14 = smov 0   ;;  %s652_s15 = smov 0  }
   0x5   :  { %s654_s16 = smov 0   ;;  %s656_s17 = smov 0  }
   0x6 LB: > { %s418_s18 = sadd.s32 4294967295, %s623_s17   ;;  %s419_s19 = sadd.s32 4294967294, %s623_s17   ;;  %s623_s17 = sphi %s656_s17, %s19_s17   ;;  %s619_s16 = sphi %s654_s16, %s803_s16   ;;  %s615_s15 = sphi %s652_s15, %s802_s15   ;;  %s611_s14 = sphi %s650_s14, %s801_s14   ;;  %s607_s13 = sphi %s648_s13, %s800_s13   ;;  %s603_s12 = sphi %s646_s12, %s799_s12  }
   0x7   : > { %s31_s20 = sadd.s32 1, %s619_s16  ;;  %s40_s21 = sadd.s32 1, %s611_s14 }
   0x8   : > { %p33_p0 = scmp.ge.s32.totalorder %s31_s20, 2  ;;  %p47_p1 = scmp.ne.s32.totalorder %s611_s14, %s607_s13 }
   0x9   : > { %p48_p2 = scmp.eq.s32.totalorder %s623_s17, 0  ;;  %p53_p3 = scmp.ne.s32.totalorder %s607_s13, %s603_s12 }
   0xa   : > { %s805_s20 = smov (%p33_p0, %s31_s20), 0  ;;  %p54_p5 = scmp.eq.s32.totalorder %s418_s18, 0 }
   0xb   : > { %p687_p4 = por %p48_p2, %p47_p1  ;;  %s35_s23 = ssub.s32 %s619_s16, %s805_s20 }
   0xc   : > { %p121_p6 = scmp.eq.s32.totalorder %s418_s18, 1  ;;  %p38_p7 = scmp.eq.s32.totalorder %s35_s23, 0 }
   0xd   : > { %p693_p8 = por %p54_p5, %p53_p3  ;;  %p127_p10 = scmp.eq.s32.totalorder %s419_s19, 1 }
   0xe   : > { %p697_p9 = por %p121_p6, %p47_p1  ;;  %p421_p12 = scmp.ge.s32.totalorder %s623_s17, 2 }
   0xf   : > { %s702_s26 = scalar_select %p38_p7, %s611_s14, %s40_s21  }
  0x10   : > { %p704_p11 = por %p127_p10, %p53_p3  ;;  %p451_p13 = scmp.lt.s32.totalorder %s623_s17, 2 }
  0x11   : > { %s153_s28 = sand.u32 1, %s611_s14   ;;  %s437_s30 = sshll.u32 %s619_s16, 3 }
  0x12   : > { %s422_s29 = sshll.u32 %s153_s28, 3  ;;  %s164_s6 = scalar_lea.hbm %s789_s0, %s437_s30 }
  0x13   : > { %s157_s7 = scalar_lea.vmem [#allocation2], %s422_s29  ;;  %s166_s9 = sshll.u32 %s164_s6, 4  ;;  %s167_s9 = int_to_ptr.hbm [resolvable:$true] %s166_s9 }
  0x14   : > { %s168_s8 = sshll.u32 %s157_s7, 4  ;;  %p444_p0 = pnand %p451_p13, %p687_p4  ;;  %s169_s8 = int_to_ptr.vmem [resolvable:$true] %s168_s8 }
  0x15   : > { %p425_p1 = scmp.ge.s32.totalorder %s623_s17, 1  ;;  %p173_p2 = scmp.lt.s32.totalorder %s623_s17, 3 }
  0x16   : > { %s154_s10 = scalar_lea.sflag [#allocation3], %s153_s28 }
  0x17   : > { %446 = dma.hbm_to_vmem [thread:$0]  (!%p444_p0), %s167_s9, 128, %s169_s8, %s154_s10  }
  0x18   : > { %p174_p3 = pnand %p425_p1, %p173_p2 }
  0x19   : > { %s720_s11 = sand.u32 (!%p174_p3), 1, %s607_s13  }
  0x1a   : > { %177 = sbr.rel (%p174_p3) target bundleno = 209 (0xd1), region = 32  ;;  %s426_s18 = sshll.u32 (!%p174_p3), %s720_s11, 3 }
  0x1b   : > { %s180_s19 = scalar_lea.sflag (!%p174_p3), [#allocation3], %s720_s11  ;;  %s183_s21 = scalar_lea.vmem (!%p174_p3), [#allocation2], %s426_s18 }
  0x1f   : > { %594 = dma.done.wait (%p693_p8), %s180_s19, 128  }
  0x20   : > { %596 = vsyncadd (%p693_p8), %s180_s19, 4294967168  ;;  %v625_v0 = vmov 0   ;;  %v730_v1 = vld [vmem:[%s183_s21] sm:$0xff]  ;;  %v211_v2 = vld [vmem:[%s791_s2] sm:$0xf]  ;;  %vm225_vm0 = vcmask 1043456  }
  0x21   : > { %502 = vset.pattern.permute.xlu0 %v625_v0  ;;  %218 = vst [vmem:[#allocation1] ss:$2 sm:$0xff] %v730_v1  ;;  %v210_v3 = vld [vmem:[%s790_s1] sm:$0xf]  ;;  %vm221_vm1 = vcmask 31744   ;;  %s438_s24 = sshll.u32 %s615_s15, 3 }
  0x22   : > { %214 = vperm.xlu0 %502, %v211_v2   ;;  %s329_s5 = scalar_lea.hbm %s792_s3, %s438_s24  ;;  %s206_s15 = scalar_lea.vmem [#allocation5], %s426_s18 }
  0x23   : > { %s331_s6 = sshll.u32 %s206_s15, 4  ;;  %s333_s7 = sshll.u32 %s329_s5, 4  ;;  %s332_s6 = int_to_ptr.vmem [resolvable:$true] %s331_s6  ;;  %s334_s7 = int_to_ptr.hbm [resolvable:$true] %s333_s7 }
  0x24   : > { %s316_s8 = scalar_lea.sflag [#allocation4], %s720_s11  ;;  %s555_s9 = sshra.s32 %s334_s7, 4  ;;  %s556_s9 = int_to_ptr.hbm [resolvable:$true] %s555_s9 }
  0x25   : > { %s557_s10 = scalar_lea.hbm %s556_s9, 8  ;;  %s561_s21 = scalar_lea.hbm %s792_s3, 16 }
  0x26   : > { %p558_p4 = scmp.ne.s32.totalorder %s556_s9, %s557_s10  ;;  %p562_p7 = scmp.lt.s32.totalorder %s556_s9, %s792_s3 }
  0x27   : > { %p563_p8 = scmp.lt.s32.totalorder %s561_s21, %s557_s10 }
  0x28   : > { %v219_v4 = vld.sshfl [vmem:[#allocation1] sm:$0xff pattern:$0x75316420]  ;;  %v220_v5 = vld.sshfl [vmem:[#allocation1 + $0x8] sm:$0xff pattern:$0x75316420]  ;;  %p559_p5 = pnand %p558_p4, %p697_p9 }
  0x29   : > { %428 = vmatpush.msk.msra.mxu0 %vm225_vm0, %v219_v4  ;;  %430 = vmatpush.msk.msra.mxu1 %vm225_vm0, %v220_v5  ;;  %p564_p10 = por %p563_p8, %p562_p7 }
  0x2a   : > { %429 = vmatmul.msk.f32.vlgmr.msra.gmra.mxu0 %vm221_vm1, %v210_v3  ;;  %431 = vmatmul.msk.f32.vlgmr.msra.gmra.mxu1 %vm221_vm1, %v210_v3  ;;  %p560_p6 = pneg %p559_p5 }
  0x2c   : > { %p565_p13 = pnand %p564_p10, %p560_p6 }
  0x94   : > { %v215_v6 = vpop.permute.xlu0 %214 }
  0xa7   : > { %v247_v7 = vpop.f32.mrf.mxu0  ;;  %v267_v8 = vpop.f32.mrf.mxu1 }
  0xa8   : > { %v248_v9 = vadd.f32 %v247_v7, %v215_v6  ;;  %v268_v10 = vadd.f32 %v267_v8, %v215_v6 }
  0xaa   : > { %v270_v11 = vsub.f32 0.0, %v248_v9  ;;  %v271_v12 = vsub.f32 0.0, %v268_v10 }
  0xac   : > { %v272_v13 = vmul.f32 1.442695, %v270_v11  ;;  %v274_v14 = vmul.f32 1.442695, %v271_v12 }
  0xae   : > { %503 = vpow2.f32 %v272_v13 }
  0xaf   : > { %505 = vpow2.f32 %v274_v14 }
  0xb4   : > { %v504_v15 = vpop.eup %503 }
  0xb5   : > { %v506_v16 = vpop.eup %505  ;;  %v276_v17 = vadd.f32 1.0, %v504_v15 }
  0xb6   : > { %v277_v18 = vadd.f32 1.0, %v506_v16 }
  0xb7   : > { %507 = vrcp.f32 %v276_v17  ;;  %vm283_vm4 = vweird.f32 %v276_v17  ;;  %v289_v29 = vand.u32 2147483648, %v276_v17  ;;  %v287_v33 = vand.u32 2147483647, %v276_v17 }
  0xb8   : > { %509 = vrcp.f32 %v277_v18  ;;  %v304_v26 = vand.u32 2147483648, %v277_v18  ;;  %v302_v28 = vand.u32 2147483647, %v277_v18  ;;  %vm298_vm6 = vweird.f32 %v277_v18 }
  0xb9   : > { %v290_v37 = vor.u32 1.1754944e-38, %v289_v29  ;;  %vm288_vm9 = vcmp.eq.f32.partialorder %v287_v33, 8.507059e+37 }
  0xba   : > { %v305_v34 = vor.u32 1.1754944e-38, %v304_v26  ;;  %vm303_vm8 = vcmp.eq.f32.partialorder %v302_v28, 8.507059e+37 }
  0xbd   : > { %v508_v19 = vpop.eup %507 }
  0xbe   : > { %v510_v20 = vpop.eup %509  ;;  %v279_v21 = vmul.f32 %v508_v19, %v276_v17  ;;  %vm284_vm2 = vweird.f32 %v508_v19 }
  0xbf   : > { %v294_v22 = vmul.f32 %v510_v20, %v277_v18  ;;  %vm299_vm3 = vweird.f32 %v510_v20  ;;  %vm742_vm5 = vmor %vm283_vm4, %vm284_vm2 }
  0xc0   : > { %v280_v23 = vsub.f32 1.0, %v279_v21  ;;  %vm300_vm7 = vmor %vm298_vm6, %vm299_vm3 }
  0xc1   : > { %v295_v24 = vsub.f32 1.0, %v294_v22 }
  0xc2   : > { %v281_v25 = vmul.f32 %v508_v19, %v280_v23 }
  0xc3   : > { %v296_v27 = vmul.f32 %v510_v20, %v295_v24 }
  0xc4   : > { %v282_v30 = vadd.f32 %v508_v19, %v281_v25 }
  0xc5   : > { %v297_v32 = vadd.f32 %v510_v20, %v296_v27 }
  0xc6   : > { %v286_v35 = vsel %vm742_vm5, %v508_v19, %v282_v30 }
  0xc7   : > { %v301_v36 = vsel %vm300_vm7, %v510_v20, %v297_v32  ;;  %v291_v40 = vsel %vm288_vm9, %v290_v37, %v286_v35 }
  0xc8   : > { %v306_v38 = vsel %vm303_vm8, %v305_v34, %v301_v36 }
  0xc9   : > { %v310_v39 = vrot.slane %v306_v38, 4 }
  0xcb   : > { %v311_v41 = vsel %vm225_vm0, %v291_v40, %v310_v39 }
  0xcc   : > { %v313_v42 = vmul.f32 %v311_v41, %v730_v1 }
  0xce   : > { %314 = vst [vmem:[%s206_s15] sm:$0xff] %v313_v42 }
  0xcf   : > { %568 = shalt.err (!%p565_p13)
}
  0xd0   : > { %441 = dma.vmem_to_hbm [thread:$0]  (%p697_p9), %s332_s6, 128, %s334_s7, %s316_s8  }
  0xd1 PF: > { %s345_s11 = sand.u32 1, %s603_s12   ;;  %p448_p0 = pnand %p421_p12, %p704_p11 }
  0xd2   : > { %s346_s28 = scalar_lea.sflag [#allocation4], %s345_s11 }
  0xd3   : > { %p449_p1 = pneg %p448_p0 }
  0xd5   : > { %598 = dma.done.wait (%p449_p1), %s346_s28, 128  }
  0xd6   : > { %600 = vsyncadd (%p449_p1), %s346_s28, 4294967168  ;;  %s19_s17 = sadd.s32 1, %s623_s17   ;;  %s799_s12 = smov %s607_s13 }
  0xd7   : > { %p16_p2 = scmp.ge.s32.totalorder %s19_s17, 4   ;;  %s800_s13 = smov %s611_s14 }
  0xd8   : > { %s801_s14 = smov %s702_s26  ;;  %s802_s15 = smov %s619_s16 }
  0xd9   : > { %s803_s16 = smov %s805_s20  ;;  %18 = sbr.rel (!%p16_p2) target bundleno = 6 (0x6), region = 77 }
  0xde   :  { %352 = vsyncpa [#allocation3], 1 }
  0xdf   :  { %354 = vsyncpa [#allocation3 + $0x1], 1 }
  0xe0   :  { %355 = vsyncpa [#allocation4], 1 }
  0xe1   :  { %357 = vsyncpa [#allocation4 + $0x1], 1 }

</bundles_post_ra>
